<compile_context>
chip_gen: v6e
topology: v6e:2x2x1
jax: 0.10.0
libtpu: 0.0.40
codegen_flags: <defaults>
</compile_context>

<pallas_src>
import jax
import jax.numpy as jnp
from jax.experimental import pallas as pl
from jax.experimental.pallas import tpu as pltpu

NORM_EPS = 1e-12   # F.normalize default eps
BN_EPS = 1e-5      # nn.BatchNorm1d default eps
KWS = (2, 3, 4, 5)


# ---------------------------------------------------------------------------
# Stage 1: fused 4-branch conv + ReLU + channel concat + L2 normalize (`cnn`)
# ---------------------------------------------------------------------------
def _cnn_kernel(p_ref, w_ref, b_ref, o_ref):
    # Single MXU matmul per row tile, f32 accumulation.
    y = jnp.dot(p_ref[...], w_ref[...], preferred_element_type=jnp.float32)
    y = jnp.maximum(y + b_ref[...], 0.0)                       # bias + ReLU (f32)
    sumsq = jnp.sum(y * y, axis=-1, keepdims=True)             # XLU cross-lane reduce
    inv = jax.lax.rsqrt(jnp.maximum(sumsq, NORM_EPS * NORM_EPS))  # EUP rsqrt
    o_ref[...] = (y * inv).astype(o_ref.dtype)


def _im2col_same(x, kh, kw):
    """PyTorch Conv2d(padding='same')-compatible patch extraction.

    x: (N, C, H, W) -> (N*H*W, C*kh*kw); patch features ordered (c, a, q) to match the
    PyTorch weight layout (out_ch, C, kh, kw).
    """
    N, C, H, W = x.shape
    pt = (kh - 1) // 2
    pb = (kh - 1) - pt
    pleft = (kw - 1) // 2
    pright = (kw - 1) - pleft
    xp = jnp.pad(x, ((0, 0), (0, 0), (pt, pb), (pleft, pright)))
    cols = []
    for a in range(kh):
        for q in range(kw):
            cols.append(xp[:, :, a:a + H, q:q + W])            # (N, C, H, W)
    patches = jnp.stack(cols, axis=2)                          # (N, C, kh*kw, H, W)
    patches = patches.transpose(0, 3, 4, 1, 2)                 # (N, H, W, C, kh*kw)
    return patches.reshape(N * H * W, C * kh * kw)


def _pack_cnn_weights(params, C, H):
    """Zero-embed each (out_ch, C, H, kw) branch weight into the shared widest (kw=5)
    column window and concatenate along output channels -> (C*H*5, 4*out_ch)."""
    kwmax = max(KWS)
    left_max = (kwmax - 1) // 2
    wcols, bs = [], []
    for idx, kw in enumerate(KWS, start=1):
        w = params[f"w{idx}"]                                  # (out_ch, C, H, kw)
        out_ch = w.shape[0]
        off = left_max - (kw - 1) // 2                         # window alignment
        w_emb = jnp.zeros((out_ch, C, H, kwmax), w.dtype)
        w_emb = w_emb.at[:, :, :, off:off + kw].set(w)
        wcols.append(w_emb.reshape(out_ch, C * H * kwmax).T)   # (K, out_ch)
        bs.append(params[f"b{idx}"])
    w_comb = jnp.concatenate(wcols, axis=1)                    # (K, 4*out_ch)
    b_comb = jnp.concatenate(bs).reshape(1, -1).astype(jnp.float32)
    return w_comb, b_comb


def _pick_tile_m(M, K, n_out, in_bytes, out_bytes,
                 budget_bytes=24 * 1024 * 1024, cap=2048):
    """Largest row tile whose pipelined buffers fit a conservative VMEM budget
    (headroom for v7x's 64 MiB physical / v5e's 16 MiB default scoped VMEM).
    cap=2048 keeps several grid steps for megacore sharding at real problem sizes."""
    fixed = 2 * K * n_out * in_bytes                           # resident weight
    per_row = 3 * K * in_bytes + 2 * n_out * out_bytes         # 3 patch + 2 out buffers
    tm = (budget_bytes - fixed) // per_row
    tm = int(max(8, min(tm, cap, M)))
    return max(8, (tm // 8) * 8)


def cnn_forward(x, params, *, matmul_dtype=jnp.bfloat16):
    """Fused Inp_Layer2: 4 parallel 'same' convs + ReLU + concat + F.normalize(dim=1).

    Returns (N, H*W, 4*out_ch): rows in (h, w) order, channels last.
    """
    N, C, H, W = x.shape
    kwmax = max(KWS)
    out_ch = params["b1"].shape[0]
    n_out = len(KWS) * out_ch                                  # 4*out_ch (== 128 here)

    w_comb, b_comb = _pack_cnn_weights(params, C, H)
    patches = _im2col_same(x, H, kwmax).astype(matmul_dtype)   # (M, K = C*H*5)
    w_comb = w_comb.astype(matmul_dtype)
    M, K = patches.shape

    in_bytes = jnp.dtype(matmul_dtype).itemsize
    tm = _pick_tile_m(M, K, n_out, in_bytes, 4)
    m_pad = pl.cdiv(M, tm) * tm
    if m_pad != M:                                             # ragged last tile
        patches = jnp.pad(patches, ((0, m_pad - M), (0, 0)))
    n_steps = m_pad // tm

    # Deeper buffering on the only large streaming operand (when it can help and the
    # installed JAX supports pipeline_mode=).
    patch_spec = pl.BlockSpec((tm, K), lambda i: (i, 0))
    if n_steps >= 3:
        try:
            patch_spec = pl.BlockSpec((tm, K), lambda i: (i, 0),
                                      pipeline_mode=pl.Buffered(3))
        except (TypeError, AttributeError):
            pass

    out_flat = pl.pallas_call(
        _cnn_kernel,
        out_shape=jax.ShapeDtypeStruct((m_pad, n_out), jnp.float32),
        grid_spec=pltpu.PrefetchScalarGridSpec(
            num_scalar_prefetch=0,
            grid=(n_steps,),
            in_specs=[patch_spec,
                      pl.BlockSpec((K, n_out), lambda i: (0, 0)),
                      pl.BlockSpec((1, n_out), lambda i: (0, 0))],
            out_specs=pl.BlockSpec((tm, n_out), lambda i: (i, 0)),
        ),
        compiler_params=pltpu.CompilerParams(
            dimension_semantics=("parallel",),
            vmem_limit_bytes=48 * 1024 * 1024),
    )(patches, w_comb, b_comb)

    return out_flat[:M].reshape(N, H * W, n_out)


# ---------------------------------------------------------------------------
# Stage 2: fc1 (Linear + Sigmoid) -> BatchNorm1d (eval) -> ste_round forward
# ---------------------------------------------------------------------------
def _head_kernel(x_ref, w_ref, b_ref, g_ref, beta_ref, mu_ref, var_ref, o_ref):
    z = jnp.dot(x_ref[...], w_ref[...], preferred_element_type=jnp.float32)
    z = jax.nn.sigmoid(z + b_ref[...])                          # Linear + Sigmoid
    inv_std = jax.lax.rsqrt(var_ref[...] + BN_EPS)              # eval-mode BatchNorm1d
    z = (z - mu_ref[...]) * inv_std * g_ref[...] + beta_ref[...]
    o_ref[...] = jnp.round(z).astype(o_ref.dtype)               # ste_round forward == round


def head_forward(feat, head):
    """feat: (N, H*W, 4*out_ch) from cnn_forward; flattened here in the same (h, w, c')
    order as the pre-permuted fc1 weight."""
    N = feat.shape[0]
    x_flat = feat.reshape(N, -1)
    out_size = head["b_fc"].shape[-1]
    return pl.pallas_call(
        _head_kernel,
        out_shape=jax.ShapeDtypeStruct((N, out_size), jnp.float32),
    )(x_flat, head["w_fc"], head["b_fc"], head["gamma"], head["beta"],
      head["mean"], head["var"])


@jax.jit
def siamese_forward(x1, x2, cnn_params, head_params):
    def forward_once(x):
        return head_forward(cnn_forward(x, cnn_params), head_params)
    return forward_once(x1), forward_once(x2)


# ---------------------------------------------------------------------------
# Parameter init (PyTorch-layout weights, then repacked for the kernels)
# ---------------------------------------------------------------------------
def init_params(key, in_ch, in_dim, width, out_ch, out_size):
    keys = jax.random.split(key, 2 * len(KWS) + 2)
    cnn = {}
    for idx, kw in enumerate(KWS, start=1):
        fan_in = in_ch * in_dim * kw
        bound = 1.0 / (fan_in ** 0.5)
        cnn[f"w{idx}"] = jax.random.uniform(
            keys[2 * (idx - 1)], (out_ch, in_ch, in_dim, kw), jnp.float32, -bound, bound)
        cnn[f"b{idx}"] = jax.random.uniform(
            keys[2 * (idx - 1) + 1], (out_ch,), jnp.float32, -bound, bound)

    c4 = len(KWS) * out_ch
    flat_dim = c4 * in_dim * width
    bound = 1.0 / (flat_dim ** 0.5)
    w_fc_torch = jax.random.uniform(keys[-2], (out_size, flat_dim),
                                    jnp.float32, -bound, bound)
    b_fc = jax.random.uniform(keys[-1], (out_size,), jnp.float32, -bound, bound)
    # Torch flattens (c', h, w); the kernels flatten (h, w, c') — permute the weight once.
    w_fc = (w_fc_torch.reshape(out_size, c4, in_dim, width)
            .transpose(0, 2, 3, 1).reshape(out_size, flat_dim).T)
    head = {
        "w_fc": w_fc,                                          # (flat_dim, out_size)
        "b_fc": b_fc.reshape(1, out_size),
        # nn.BatchNorm1d defaults (eval mode / running statistics).
        "gamma": jnp.ones((1, out_size), jnp.float32),
        "beta": jnp.zeros((1, out_size), jnp.float32),
        "mean": jnp.zeros((1, out_size), jnp.float32),
        "var": jnp.ones((1, out_size), jnp.float32),
    }
    return cnn, head


def _cnn_reference(x, params):
    """Plain-JAX per-branch reference for the cnn stage (used as a sanity check)."""
    N, C, H, W = x.shape
    outs = []
    for idx, kw in enumerate(KWS, start=1):
        patches = _im2col_same(x, H, kw)
        w = params[f"w{idx}"].reshape(params[f"w{idx}"].shape[0], -1).T
        outs.append(jnp.maximum(patches @ w + params[f"b{idx}"][None, :], 0.0))
    out = jnp.concatenate(outs, axis=-1)
    norm = jnp.sqrt(jnp.sum(out * out, axis=-1, keepdims=True))
    out = out / jnp.maximum(norm, NORM_EPS)
    return out.reshape(N, H * W, -1)


if __name__ == "__main__":
    key = jax.random.PRNGKey(0)
    kx1, kx2, kp = jax.random.split(key, 3)

    # Small shapes consistent with the module: NCHW input with H == in_dim (the conv
    # kernel height), 4 branches of out_ch channels, fc1 -> out_size.
    N, in_ch, in_dim, width, out_ch, out_size = 2, 4, 8, 16, 32, 32
    x1 = jax.random.normal(kx1, (N, in_ch, in_dim, width), jnp.float32)
    x2 = jax.random.normal(kx2, (N, in_ch, in_dim, width), jnp.float32)
    cnn_params, head_params = init_params(kp, in_ch, in_dim, width, out_ch, out_size)

    # Sanity-check the fused single-matmul cnn stage against a per-branch reference
    # (generous tolerance: matmul operands are bf16).
    got = cnn_forward(x1, cnn_params)
    ref = _cnn_reference(x1, cnn_params)
    err = float(jnp.max(jnp.abs(got - ref)))
    assert err < 5e-2, f"cnn stage mismatch: max abs err {err}"

    out1, out2 = siamese_forward(x1, x2, cnn_params, head_params)
    jax.block_until_ready((out1, out2))
    assert out1.shape == (N, out_size) and out2.shape == (N, out_size)
    assert bool(jnp.all(jnp.isfinite(out1))) and bool(jnp.all(jnp.isfinite(out2)))
    print("KERNEL_OK")
</pallas_src>

<mosaic_0001>
module attributes {stable_mosaic.version = 11 : i64} {
  func.func @_cnn_kernel(%arg0: i32, %arg1: memref<256x160xbf16, #tpu.memory_space<vmem>>, %arg2: memref<160x128xbf16, #tpu.memory_space<vmem>>, %arg3: memref<1x128xf32, #tpu.memory_space<vmem>>, %arg4: memref<256x128xf32, #tpu.memory_space<vmem>>) attributes {dimension_semantics = [#tpu.dimension_semantics<parallel>], iteration_bounds = array<i64: 1>, scalar_prefetch = 0 : i64, scratch_operands = 0 : i64, tpu.core_type = #tpu.core_type<tc>, window_params = [{transform_indices = @transform_0, window_bounds = array<i64: 256, 160>}, {pipeline_mode = #tpu.pipeline_mode<synchronous>, transform_indices = @transform_1, window_bounds = array<i64: 160, 128>}, {pipeline_mode = #tpu.pipeline_mode<synchronous>, transform_indices = @transform_2, window_bounds = array<i64: 1, 128>}, {transform_indices = @transform_3, window_bounds = array<i64: 256, 128>}]} {
    %c0 = arith.constant 0 : index
    %c0_0 = arith.constant 0 : index
    %0 = vector.load %arg1[%c0, %c0_0] : memref<256x160xbf16, #tpu.memory_space<vmem>>, vector<256x160xbf16>
    %c0_1 = arith.constant 0 : index
    %c0_2 = arith.constant 0 : index
    %1 = vector.load %arg2[%c0_1, %c0_2] : memref<160x128xbf16, #tpu.memory_space<vmem>>, vector<160x128xbf16>
    %cst = arith.constant dense<0.000000e+00> : vector<256x128xf32>
    %2 = tpu.matmul %0, %1, %cst {dimension_numbers = #tpu.dot_dimension_numbers<[1], [0], [0], [1], [0, 0, 1, 1], [], []>} : vector<256x160xbf16>, vector<160x128xbf16>, vector<256x128xf32> -> vector<256x128xf32>
    %c0_3 = arith.constant 0 : index
    %c0_4 = arith.constant 0 : index
    %3 = vector.load %arg3[%c0_3, %c0_4] : memref<1x128xf32, #tpu.memory_space<vmem>>, vector<1x128xf32>
    %4 = vector.broadcast %3 : vector<1x128xf32> to vector<256x128xf32>
    %5 = arith.addf %2, %4 : vector<256x128xf32>
    %cst_5 = arith.constant 0.000000e+00 : f32
    %6 = vector.broadcast %cst_5 : f32 to vector<256x128xf32>
    %7 = arith.maximumf %5, %6 : vector<256x128xf32>
    %8 = arith.mulf %7, %7 : vector<256x128xf32>
    %cst_6 = arith.constant dense<0.000000e+00> : vector<256xf32>
    %9 = vector.multi_reduction <add>, %8, %cst_6 [1] : vector<256x128xf32> to vector<256xf32>
    %10 = vector.shape_cast %9 : vector<256xf32> to vector<256x1xf32>
    %cst_7 = arith.constant 1.000000e-24 : f32
    %11 = vector.broadcast %cst_7 : f32 to vector<256x1xf32>
    %12 = arith.maximumf %10, %11 : vector<256x1xf32>
    %13 = math.rsqrt %12 : vector<256x1xf32>
    %14 = vector.broadcast %13 : vector<256x1xf32> to vector<256x128xf32>
    %15 = arith.mulf %7, %14 : vector<256x128xf32>
    %c0_8 = arith.constant 0 : index
    %c0_9 = arith.constant 0 : index
    %16 = vector.load %arg4[%c0_8, %c0_9] : memref<256x128xf32, #tpu.memory_space<vmem>>, vector<256x128xf32>
    tpu.vector_store %arg4[%c0_8, %c0_9], %15 {strides = array<i32>} : memref<256x128xf32, #tpu.memory_space<vmem>>, vector<256x128xf32>,
    return
  }
  func.func @transform_0(%arg0: i32) -> (i32, i32) {
    %c0_i32 = arith.constant 0 : i32
    %c0_i32_0 = arith.constant 0 : i32
    return %arg0, %c0_i32 : i32, i32
  }
  func.func @transform_1(%arg0: i32) -> (i32, i32) {
    %c0_i32 = arith.constant 0 : i32
    %c0_i32_0 = arith.constant 0 : i32
    %c0_i32_1 = arith.constant 0 : i32
    return %c0_i32, %c0_i32_0 : i32, i32
  }
  func.func @transform_2(%arg0: i32) -> (i32, i32) {
    %c0_i32 = arith.constant 0 : i32
    %c0_i32_0 = arith.constant 0 : i32
    %c0_i32_1 = arith.constant 0 : i32
    return %c0_i32, %c0_i32_0 : i32, i32
  }
  func.func @transform_3(%arg0: i32) -> (i32, i32) {
    %c0_i32 = arith.constant 0 : i32
    %c0_i32_0 = arith.constant 0 : i32
    return %arg0, %c0_i32 : i32, i32
  }
}

</mosaic_0001>

<bundles_post_ra>
// kernel: tpu_custom_call.1
= control target key start
LH: loop header
LB: loop body
LE: loop exit
PB: predicated region body
PF: predicated region fallthrough
CT: control target
= control target key end

     0   :  { %v988_v1 = vmov 0   ;;  %vm279_vm0 = vcmask 261120   ;;  %s1354_s0 = inlined_call_operand.vmem [shape: bf16[256,160], index: 0, kind: input, shape index: {}]   ;;  %s1355_s1 = inlined_call_operand.vmem [shape: bf16[160,128], index: 1, kind: input, shape index: {}]   ;;  %s1356_s2 = inlined_call_operand.vmem [shape: f32[1,128], index: 2, kind: input, shape index: {}]   ;;  %s1357_s3 = inlined_call_operand.hbm [shape: f32[256,128], index: 3, kind: output, shape index: {}]  }
   0x1   :  { %v844_v0 = vld [vmem:[%s1355_s1 + $0x38] sm:$0xff]   ;;  %328 = vmatprep.subr.bf16.mxu0 %v988_v1  ;;  %820 = vmatprep.subr.bf16.mxu1 %v988_v1  ;;  %v845_v2 = vld [vmem:[%s1355_s1 + $0x30] sm:$0xff]   ;;  %v846_v3 = vld [vmem:[%s1355_s1 + $0x28] sm:$0xff]  }
   0x2   :  { %329 = vmatpush1.bf16.msra.mxu0 %v844_v0  ;;  %830 = vmatpush1.bf16.msra.mxu1 %v844_v0  ;;  %v847_v4 = vld [vmem:[%s1355_s1 + $0x20] sm:$0xff]   ;;  %v848_v7 = vld [vmem:[%s1355_s1 + $0x18] sm:$0xff]   ;;  %v849_v8 = vld [vmem:[%s1355_s1 + $0x10] sm:$0xff]  }
   0x3   :  { %330 = vmatprep.subr.bf16.mxu0 %v988_v1  ;;  %821 = vmatprep.subr.bf16.mxu1 %v988_v1  ;;  %v856_v5 = vld [vmem:[%s1354_s0 + $0x4] ss:$8 sps:$4 sm:$0xff]  }
   0x4   :  { %v859_v6 = vld [vmem:[%s1354_s0 + $0x84] ss:$8 sps:$4 sm:$0xff]   ;;  %804 = vmatprep.mubr.msk.bf16.mxu0 %vm279_vm0, %v856_v5 }
   0x5   :  { %812 = vmatprep.mubr.msk.bf16.mxu1 %vm279_vm0, %v859_v6  ;;  %v850_v9 = vld [vmem:[%s1355_s1 + $0x8] sm:$0xff]   ;;  %v851_v10 = vld [vmem:[%s1355_s1] sm:$0xff]  }
   0x6   :  { %331 = vmatpush1.bf16.msra.mxu0 %v845_v2  ;;  %831 = vmatpush1.bf16.msra.mxu1 %v845_v2  ;;  %v852_v11 = vld [vmem:[%s1355_s1 + $0x48] sm:$0xff]  }
   0x7   :  { %332 = vmatprep.subr.bf16.mxu0 %v988_v1  ;;  %822 = vmatprep.subr.bf16.mxu1 %v988_v1 }
   0xa   :  { %333 = vmatpush1.bf16.msra.mxu0 %v846_v3  ;;  %832 = vmatpush1.bf16.msra.mxu1 %v846_v3 }
   0xb   :  { %334 = vmatprep.subr.bf16.mxu0 %v988_v1  ;;  %823 = vmatprep.subr.bf16.mxu1 %v988_v1 }
   0xe   :  { %335 = vmatpush1.bf16.msra.mxu0 %v847_v4  ;;  %833 = vmatpush1.bf16.msra.mxu1 %v847_v4 }
   0xf   :  { %336 = vmatprep.subr.bf16.mxu0 %v988_v1  ;;  %824 = vmatprep.subr.bf16.mxu1 %v988_v1 }
  0x12   :  { %337 = vmatpush1.bf16.msra.mxu0 %v848_v7  ;;  %834 = vmatpush1.bf16.msra.mxu1 %v848_v7 }
  0x13   :  { %338 = vmatprep.subr.bf16.mxu0 %v988_v1  ;;  %825 = vmatprep.subr.bf16.mxu1 %v988_v1 }
  0x16   :  { %339 = vmatpush1.bf16.msra.mxu0 %v849_v8  ;;  %835 = vmatpush1.bf16.msra.mxu1 %v849_v8 }
  0x17   :  { %340 = vmatprep.subr.bf16.mxu0 %v988_v1  ;;  %826 = vmatprep.subr.bf16.mxu1 %v988_v1 }
  0x1a   :  { %341 = vmatpush1.bf16.msra.mxu0 %v850_v9  ;;  %836 = vmatpush1.bf16.msra.mxu1 %v850_v9 }
  0x1b   :  { %342 = vmatprep.subr.bf16.mxu0 %v988_v1  ;;  %827 = vmatprep.subr.bf16.mxu1 %v988_v1 }
  0x1e   :  { %343 = vmatpush1.bf16.msra.mxu0 %v851_v10  ;;  %837 = vmatpush1.bf16.msra.mxu1 %v851_v10 }
  0x1f   :  { %356 = vmatprep.subr.bf16.mxu0 %v988_v1  ;;  %828 = vmatprep.subr.bf16.mxu1 %v988_v1 }
  0x20   :  { %8 = vsyncpa [#allocation3], 0  ;;  %v853_v12 = vld [vmem:[%s1355_s1 + $0x40] sm:$0xff]   ;;  %v860_v15 = vld [vmem:[%s1354_s0 + $0x14] ss:$8 sps:$4 sm:$0xff]  }
  0x21   :  { %v854_v13 = vld [vmem:[%s1354_s0] ss:$8 sps:$4 sm:$0xff]   ;;  %v862_v16 = vld [vmem:[%s1354_s0 + $0x94] ss:$8 sps:$4 sm:$0xff]   ;;  %v864_v17 = vld [vmem:[%s1354_s0 + $0x10] ss:$8 sps:$4 sm:$0xff]  }
  0x22   :  { %357 = vmatpush2.bf16.msra.mxu0 %v852_v11  ;;  %838 = vmatpush2.bf16.msra.mxu1 %v852_v11  ;;  %v857_v14 = vld [vmem:[%s1354_s0 + $0x80] ss:$8 sps:$4 sm:$0xff]   ;;  %v865_v18 = vld [vmem:[%s1354_s0 + $0x90] ss:$8 sps:$4 sm:$0xff]   ;;  %v866_v19 = vld [vmem:[%s1354_s0 + $0x24] ss:$8 sps:$4 sm:$0xff]  }
  0x23   :  { %358 = vmatprep.subr.bf16.mxu0 %v988_v1  ;;  %829 = vmatprep.subr.bf16.mxu1 %v988_v1  ;;  %v868_v20 = vld [vmem:[%s1354_s0 + $0xa4] ss:$8 sps:$4 sm:$0xff]   ;;  %v870_v21 = vld [vmem:[%s1354_s0 + $0x20] ss:$8 sps:$4 sm:$0xff]   ;;  %v872_v23 = vld [vmem:[%s1354_s0 + $0x34] ss:$8 sps:$4 sm:$0xff]  }
  0x24   :  { %v871_v22 = vld [vmem:[%s1354_s0 + $0xa0] ss:$8 sps:$4 sm:$0xff]   ;;  %v874_v24 = vld [vmem:[%s1354_s0 + $0xb4] ss:$8 sps:$4 sm:$0xff]   ;;  %v876_v25 = vld [vmem:[%s1354_s0 + $0x30] ss:$8 sps:$4 sm:$0xff]  }
  0x25   :  { %v877_v26 = vld [vmem:[%s1354_s0 + $0xb0] ss:$8 sps:$4 sm:$0xff]   ;;  %v878_v27 = vld [vmem:[%s1354_s0 + $0x44] ss:$8 sps:$4 sm:$0xff]   ;;  %v882_v29 = vld [vmem:[%s1354_s0 + $0x40] ss:$8 sps:$4 sm:$0xff]  }
  0x26   :  { %359 = vmatpush2.bf16.msra.mxu0 %v853_v12  ;;  %839 = vmatpush2.bf16.msra.mxu1 %v853_v12  ;;  %v880_v28 = vld [vmem:[%s1354_s0 + $0xc4] ss:$8 sps:$4 sm:$0xff]   ;;  %v883_v30 = vld [vmem:[%s1354_s0 + $0xc0] ss:$8 sps:$4 sm:$0xff]   ;;  %v884_v31 = vld [vmem:[%s1354_s0 + $0x54] ss:$8 sps:$4 sm:$0xff]  }
  0x27   :  { %v886_v32 = vld [vmem:[%s1354_s0 + $0xd4] ss:$8 sps:$4 sm:$0xff]   ;;  %v888_v33 = vld [vmem:[%s1354_s0 + $0x50] ss:$8 sps:$4 sm:$0xff]   ;;  %v890_v35 = vld [vmem:[%s1354_s0 + $0x64] ss:$8 sps:$4 sm:$0xff]  }
  0x28   :  { %v889_v34 = vld [vmem:[%s1354_s0 + $0xd0] ss:$8 sps:$4 sm:$0xff]   ;;  %v892_v36 = vld [vmem:[%s1354_s0 + $0xe4] ss:$8 sps:$4 sm:$0xff]   ;;  %v894_v37 = vld [vmem:[%s1354_s0 + $0x60] ss:$8 sps:$4 sm:$0xff]  }
  0x29   :  { %361 = vmatmul.mubr.bf16.vlgmr.msra.gmra.mxu0 %v854_v13  ;;  %425 = vmatmul.mubr.bf16.vlgmr.msra.gmra.mxu1 %v857_v14  ;;  %v895_v38 = vld [vmem:[%s1354_s0 + $0xe0] ss:$8 sps:$4 sm:$0xff]   ;;  %v896_v39 = vld [vmem:[%s1354_s0 + $0x74] ss:$8 sps:$4 sm:$0xff]   ;;  %v900_v41 = vld [vmem:[%s1354_s0 + $0x70] ss:$8 sps:$4 sm:$0xff]  }
  0x2a   :  { %805 = vmatprep.mubr.msk.bf16.mxu0 %vm279_vm0, %v860_v15  ;;  %813 = vmatprep.mubr.msk.bf16.mxu1 %vm279_vm0, %v862_v16  ;;  %v898_v40 = vld [vmem:[%s1354_s0 + $0xf4] ss:$8 sps:$4 sm:$0xff]   ;;  %v901_v42 = vld [vmem:[%s1354_s0 + $0xf0] ss:$8 sps:$4 sm:$0xff]   ;;  %v1157_v43 = vld [vmem:[%s1356_s2] ss:$0 sm:$0xff] }
  0x2b   :  { %s989_s0 = smov [#allocation2]  }
  0x2c   :  { %s750_s2 = sshll.u32 %s989_s0, 4  ;;  %s751_s2 = int_to_ptr.vmem [resolvable:$true] %s750_s2 }
  0x2d   :  { %s966_s15 = scalar_lea.vmem %s751_s2, 4096  ;;  %p971_p1 = scmp.lt.s32.totalorder %s751_s2, %s751_s2 }
  0x2e   :  { %p967_p0 = scmp.ne.s32.totalorder %s751_s2, %s966_s15  ;;  %p972_p2 = scmp.lt.s32.totalorder %s966_s15, %s966_s15 }
  0x30   :  { %p973_p3 = por %p972_p2, %p971_p1 }
  0x31   :  { %369 = vmatmul.mubr.bf16.gmra.mxu0 %v864_v17  ;;  %433 = vmatmul.mubr.bf16.gmra.mxu1 %v865_v18 }
  0x32   :  { %806 = vmatprep.mubr.msk.bf16.mxu0 %vm279_vm0, %v866_v19  ;;  %814 = vmatprep.mubr.msk.bf16.mxu1 %vm279_vm0, %v868_v20  ;;  %p974_p4 = pnand %p973_p3, %p967_p0 }
  0x39   :  { %377 = vmatmul.mubr.bf16.gmra.mxu0 %v870_v21  ;;  %441 = vmatmul.mubr.bf16.gmra.mxu1 %v871_v22 }
  0x3a   :  { %807 = vmatprep.mubr.msk.bf16.mxu0 %vm279_vm0, %v872_v23  ;;  %815 = vmatprep.mubr.msk.bf16.mxu1 %vm279_vm0, %v874_v24 }
  0x41   :  { %385 = vmatmul.mubr.bf16.gmra.mxu0 %v876_v25  ;;  %449 = vmatmul.mubr.bf16.gmra.mxu1 %v877_v26 }
  0x42   :  { %808 = vmatprep.mubr.msk.bf16.mxu0 %vm279_vm0, %v878_v27  ;;  %816 = vmatprep.mubr.msk.bf16.mxu1 %vm279_vm0, %v880_v28 }
  0x49   :  { %393 = vmatmul.mubr.bf16.gmra.mxu0 %v882_v29  ;;  %457 = vmatmul.mubr.bf16.gmra.mxu1 %v883_v30 }
  0x4a   :  { %809 = vmatprep.mubr.msk.bf16.mxu0 %vm279_vm0, %v884_v31  ;;  %817 = vmatprep.mubr.msk.bf16.mxu1 %vm279_vm0, %v886_v32 }
  0x51   :  { %401 = vmatmul.mubr.bf16.gmra.mxu0 %v888_v33  ;;  %465 = vmatmul.mubr.bf16.gmra.mxu1 %v889_v34 }
  0x52   :  { %810 = vmatprep.mubr.msk.bf16.mxu0 %vm279_vm0, %v890_v35  ;;  %818 = vmatprep.mubr.msk.bf16.mxu1 %vm279_vm0, %v892_v36 }
  0x59   :  { %409 = vmatmul.mubr.bf16.gmra.mxu0 %v894_v37  ;;  %473 = vmatmul.mubr.bf16.gmra.mxu1 %v895_v38 }
  0x5a   :  { %811 = vmatprep.mubr.msk.bf16.mxu0 %vm279_vm0, %v896_v39  ;;  %819 = vmatprep.mubr.msk.bf16.mxu1 %vm279_vm0, %v898_v40 }
  0x61   :  { %417 = vmatmul.mubr.bf16.gmra.mxu0 %v900_v41  ;;  %481 = vmatmul.mubr.bf16.gmra.mxu1 %v901_v42 }
  0xe9   :  { %v362_v44 = vpop.f32.mrf.mxu0  ;;  %v426_v45 = vpop.f32.mrf.mxu1 }
  0xea   :  { %v363_v46 = vadd.f32 %v1157_v43, %v362_v44  ;;  %v427_v47 = vadd.f32 %v1157_v43, %v426_v45 }
  0xeb   :  { %v364_v48 = vpop.f32.mrf.mxu0  ;;  %v428_v49 = vpop.f32.mrf.mxu1 }
  0xec   :  { %v1161_v50 = vmax.f32 %v363_v46, 0.0  ;;  %v1163_v51 = vmax.f32 %v427_v47, 0.0 }
  0xed   :  { %v365_v52 = vpop.f32.mrf.mxu0  ;;  %v429_v53 = vpop.f32.mrf.mxu1 }
  0xee   :  { %v366_v54 = vadd.f32 %v1157_v43, %v365_v52  ;;  %v430_v55 = vadd.f32 %v1157_v43, %v429_v53  ;;  %v521_v56 = vmul.f32 %v1161_v50, %v1161_v50  ;;  %v537_v62 = vmul.f32 %v1163_v51, %v1163_v51 }
  0xef   :  { %v367_v57 = vpop.f32.mrf.mxu0  ;;  %v431_v58 = vpop.f32.mrf.mxu1 }
  0xf0   :  { %v1169_v59 = vmax.f32 %v430_v55, 0.0  ;;  %553 = vadd.xlane.f32.xlu0 %v521_v56  ;;  %v1173_v63 = vmax.f32 %v366_v54, 0.0 }
  0xf1   :  { %v370_v60 = vpop.f32.mrf.mxu0  ;;  %v434_v61 = vpop.f32.mrf.mxu1 }
  0xf2   :  { %v371_v0 = vadd.f32 %v1157_v43, %v370_v60  ;;  %v435_v1 = vadd.f32 %v1157_v43, %v434_v61  ;;  %v538_v2 = vmul.f32 %v1169_v59, %v1169_v59  ;;  %v522_v12 = vmul.f32 %v1173_v63, %v1173_v63 }
  0xf3   :  { %v372_v3 = vpop.f32.mrf.mxu0  ;;  %v436_v4 = vpop.f32.mrf.mxu1 }
  0xf4   :  { %v1179_v5 = vmax.f32 %v371_v0, 0.0  ;;  %v1181_v6 = vmax.f32 %v435_v1, 0.0  ;;  %587 = vadd.xlane.f32.xlu1 %v538_v2  ;;  %585 = vadd.xlane.f32.xlu0 %v537_v62 }
  0xf5   :  { %v373_v7 = vpop.f32.mrf.mxu0  ;;  %v437_v8 = vpop.f32.mrf.mxu1 }
  0xf6   :  { %v374_v9 = vadd.f32 %v1157_v43, %v373_v7  ;;  %v438_v10 = vadd.f32 %v1157_v43, %v437_v8  ;;  %v523_v11 = vmul.f32 %v1179_v5, %v1179_v5  ;;  %v539_v16 = vmul.f32 %v1181_v6, %v1181_v6 }
  0xf7   :  { %v375_v13 = vpop.f32.mrf.mxu0  ;;  %v439_v14 = vpop.f32.mrf.mxu1 }
  0xf8   :  { %v1189_v15 = vmax.f32 %v374_v9, 0.0  ;;  %557 = vadd.xlane.f32.xlu1 %v523_v11  ;;  %555 = vadd.xlane.f32.xlu0 %v522_v12  ;;  %v1193_v19 = vmax.f32 %v438_v10, 0.0 }
  0xf9   :  { %v378_v17 = vpop.f32.mrf.mxu0  ;;  %v442_v18 = vpop.f32.mrf.mxu1 }
  0xfa   :  { %v379_v20 = vadd.f32 %v1157_v43, %v378_v17  ;;  %v443_v21 = vadd.f32 %v1157_v43, %v442_v18  ;;  %v524_v22 = vmul.f32 %v1189_v15, %v1189_v15  ;;  %v540_v31 = vmul.f32 %v1193_v19, %v1193_v19 }
  0xfb   :  { %v380_v23 = vpop.f32.mrf.mxu0  ;;  %v444_v24 = vpop.f32.mrf.mxu1 }
  0xfc   :  { %v1199_v25 = vmax.f32 %v379_v20, 0.0  ;;  %v1201_v26 = vmax.f32 %v443_v21, 0.0  ;;  %559 = vadd.xlane.f32.xlu1 %v524_v22  ;;  %589 = vadd.xlane.f32.xlu0 %v539_v16 }
  0xfd   :  { %v381_v27 = vpop.f32.mrf.mxu0  ;;  %v445_v28 = vpop.f32.mrf.mxu1 }
  0xfe   :  { %v382_v29 = vadd.f32 %v1157_v43, %v381_v27  ;;  %v446_v30 = vadd.f32 %v1157_v43, %v445_v28  ;;  %v525_v32 = vmul.f32 %v1199_v25, %v1199_v25  ;;  %v541_v36 = vmul.f32 %v1201_v26, %v1201_v26 }
  0xff   :  { %v383_v33 = vpop.f32.mrf.mxu0  ;;  %v447_v34 = vpop.f32.mrf.mxu1 }
 0x100   :  { %v1209_v35 = vmax.f32 %v382_v29, 0.0  ;;  %591 = vadd.xlane.f32.xlu1 %v540_v31  ;;  %561 = vadd.xlane.f32.xlu0 %v525_v32  ;;  %v1213_v39 = vmax.f32 %v446_v30, 0.0 }
 0x101   :  { %v386_v37 = vpop.f32.mrf.mxu0  ;;  %v450_v38 = vpop.f32.mrf.mxu1 }
 0x102   :  { %v387_v40 = vadd.f32 %v1157_v43, %v386_v37  ;;  %v451_v41 = vadd.f32 %v1157_v43, %v450_v38  ;;  %v526_v42 = vmul.f32 %v1209_v35, %v1209_v35  ;;  %v542_v54 = vmul.f32 %v1213_v39, %v1213_v39 }
 0x103   :  { %v388_v44 = vpop.f32.mrf.mxu0  ;;  %v452_v45 = vpop.f32.mrf.mxu1 }
 0x104   :  { %v1219_v46 = vmax.f32 %v387_v40, 0.0  ;;  %v1221_v47 = vmax.f32 %v451_v41, 0.0  ;;  %563 = vadd.xlane.f32.xlu1 %v526_v42  ;;  %593 = vadd.xlane.f32.xlu0 %v541_v36 }
 0x105   :  { %v389_v48 = vpop.f32.mrf.mxu0  ;;  %v453_v49 = vpop.f32.mrf.mxu1 }
 0x106   :  { %v390_v52 = vadd.f32 %v1157_v43, %v389_v48  ;;  %v454_v53 = vadd.f32 %v1157_v43, %v453_v49  ;;  %v527_v55 = vmul.f32 %v1219_v46, %v1219_v46  ;;  %v543_v60 = vmul.f32 %v1221_v47, %v1221_v47 }
 0x107   :  { %v391_v56 = vpop.f32.mrf.mxu0  ;;  %v455_v57 = vpop.f32.mrf.mxu1 }
 0x108   :  { %v1229_v58 = vmax.f32 %v390_v52, 0.0  ;;  %595 = vadd.xlane.f32.xlu1 %v542_v54  ;;  %565 = vadd.xlane.f32.xlu0 %v527_v55  ;;  %v1233_v0 = vmax.f32 %v454_v53, 0.0 }
 0x109   :  { %v394_v61 = vpop.f32.mrf.mxu0  ;;  %v458_v62 = vpop.f32.mrf.mxu1 }
 0x10a   :  { %v395_v1 = vadd.f32 %v1157_v43, %v394_v61  ;;  %v459_v2 = vadd.f32 %v1157_v43, %v458_v62  ;;  %v528_v3 = vmul.f32 %v1229_v58, %v1229_v58  ;;  %v544_v14 = vmul.f32 %v1233_v0, %v1233_v0 }
 0x10b   :  { %v396_v4 = vpop.f32.mrf.mxu0  ;;  %v460_v7 = vpop.f32.mrf.mxu1 }
 0x10c   :  { %v1239_v8 = vmax.f32 %v395_v1, 0.0  ;;  %v1241_v9 = vmax.f32 %v459_v2, 0.0  ;;  %567 = vadd.xlane.f32.xlu1 %v528_v3  ;;  %597 = vadd.xlane.f32.xlu0 %v543_v60 }
 0x10d   :  { %v397_v10 = vpop.f32.mrf.mxu0  ;;  %v461_v11 = vpop.f32.mrf.mxu1 }
 0x10e   :  { %v398_v12 = vadd.f32 %v1157_v43, %v397_v10  ;;  %v462_v13 = vadd.f32 %v1157_v43, %v461_v11  ;;  %v529_v16 = vmul.f32 %v1239_v8, %v1239_v8  ;;  %v545_v21 = vmul.f32 %v1241_v9, %v1241_v9 }
 0x10f   :  { %v399_v17 = vpop.f32.mrf.mxu0  ;;  %v463_v18 = vpop.f32.mrf.mxu1 }
 0x110   :  { %v1249_v20 = vmax.f32 %v398_v12, 0.0  ;;  %599 = vadd.xlane.f32.xlu1 %v544_v14  ;;  %569 = vadd.xlane.f32.xlu0 %v529_v16  ;;  %v1253_v24 = vmax.f32 %v462_v13, 0.0 }
 0x111   :  { %v402_v22 = vpop.f32.mrf.mxu0  ;;  %v466_v23 = vpop.f32.mrf.mxu1 }
 0x112   :  { %v403_v27 = vadd.f32 %v1157_v43, %v402_v22  ;;  %v467_v28 = vadd.f32 %v1157_v43, %v466_v23  ;;  %v530_v29 = vmul.f32 %v1249_v20, %v1249_v20  ;;  %v546_v40 = vmul.f32 %v1253_v24, %v1253_v24 }
 0x113   :  { %v404_v30 = vpop.f32.mrf.mxu0  ;;  %v468_v31 = vpop.f32.mrf.mxu1 }
 0x114   :  { %v1259_v32 = vmax.f32 %v403_v27, 0.0  ;;  %v1261_v33 = vmax.f32 %v467_v28, 0.0  ;;  %571 = vadd.xlane.f32.xlu1 %v530_v29  ;;  %601 = vadd.xlane.f32.xlu0 %v545_v21 }
 0x115   :  { %v405_v34 = vpop.f32.mrf.mxu0  ;;  %v469_v36 = vpop.f32.mrf.mxu1 }
 0x116   :  { %v406_v37 = vadd.f32 %v1157_v43, %v405_v34  ;;  %v470_v38 = vadd.f32 %v1157_v43, %v469_v36  ;;  %v531_v41 = vmul.f32 %v1259_v32, %v1259_v32  ;;  %v547_v48 = vmul.f32 %v1261_v33, %v1261_v33 }
 0x117   :  { %v407_v42 = vpop.f32.mrf.mxu0  ;;  %v471_v44 = vpop.f32.mrf.mxu1 }
 0x118   :  { %v1269_v45 = vmax.f32 %v406_v37, 0.0  ;;  %603 = vadd.xlane.f32.xlu1 %v546_v40  ;;  %573 = vadd.xlane.f32.xlu0 %v531_v41  ;;  %v1273_v53 = vmax.f32 %v470_v38, 0.0 }
 0x119   :  { %v410_v49 = vpop.f32.mrf.mxu0  ;;  %v474_v52 = vpop.f32.mrf.mxu1 }
 0x11a   :  { %v411_v54 = vadd.f32 %v1157_v43, %v410_v49  ;;  %v475_v55 = vadd.f32 %v1157_v43, %v474_v52  ;;  %v532_v56 = vmul.f32 %v1269_v45, %v1269_v45  ;;  %v548_v7 = vmul.f32 %v1273_v53, %v1273_v53 }
 0x11b   :  { %v412_v57 = vpop.f32.mrf.mxu0  ;;  %v476_v60 = vpop.f32.mrf.mxu1 }
 0x11c   :  { %v1279_v61 = vmax.f32 %v411_v54, 0.0  ;;  %v1281_v62 = vmax.f32 %v475_v55, 0.0  ;;  %575 = vadd.xlane.f32.xlu1 %v532_v56  ;;  %605 = vadd.xlane.f32.xlu0 %v547_v48 }
 0x11d   :  { %v413_v1 = vpop.f32.mrf.mxu0  ;;  %v477_v2 = vpop.f32.mrf.mxu1 }
 0x11e   :  { %v414_v3 = vadd.f32 %v1157_v43, %v413_v1  ;;  %v478_v4 = vadd.f32 %v1157_v43, %v477_v2  ;;  %v533_v10 = vmul.f32 %v1279_v61, %v1279_v61  ;;  %v549_v14 = vmul.f32 %v1281_v62, %v1281_v62 }
 0x11f   :  { %v415_v11 = vpop.f32.mrf.mxu0  ;;  %v479_v12 = vpop.f32.mrf.mxu1 }
 0x120   :  { %v1289_v13 = vmax.f32 %v414_v3, 0.0  ;;  %607 = vadd.xlane.f32.xlu1 %v548_v7  ;;  %577 = vadd.xlane.f32.xlu0 %v533_v10  ;;  %v1293_v18 = vmax.f32 %v478_v4, 0.0 }
 0x121   :  { %v418_v16 = vpop.f32.mrf.mxu0  ;;  %v482_v17 = vpop.f32.mrf.mxu1 }
 0x122   :  { %v419_v21 = vadd.f32 %v1157_v43, %v418_v16  ;;  %v483_v22 = vadd.f32 %v1157_v43, %v482_v17  ;;  %v534_v23 = vmul.f32 %v1289_v13, %v1289_v13  ;;  %v550_v38 = vmul.f32 %v1293_v18, %v1293_v18 }
 0x123   :  { %v420_v27 = vpop.f32.mrf.mxu0  ;;  %v484_v28 = vpop.f32.mrf.mxu1 }
 0x124   :  { %v1299_v29 = vmax.f32 %v419_v21, 0.0  ;;  %v1301_v30 = vmax.f32 %v483_v22, 0.0  ;;  %579 = vadd.xlane.f32.xlu1 %v534_v23  ;;  %609 = vadd.xlane.f32.xlu0 %v549_v14 }
 0x125   :  { %v421_v31 = vpop.f32.mrf.mxu0  ;;  %v485_v34 = vpop.f32.mrf.mxu1 }
 0x126   :  { %v422_v36 = vadd.f32 %v1157_v43, %v421_v31  ;;  %v486_v37 = vadd.f32 %v1157_v43, %v485_v34  ;;  %v535_v40 = vmul.f32 %v1299_v29, %v1299_v29  ;;  %v551_v48 = vmul.f32 %v1301_v30, %v1301_v30 }
 0x127   :  { %v423_v41 = vpop.f32.mrf.mxu0  ;;  %v487_v42 = vpop.f32.mrf.mxu1 }
 0x128   :  { %v1309_v44 = vmax.f32 %v422_v36, 0.0  ;;  %611 = vadd.xlane.f32.xlu1 %v550_v38  ;;  %581 = vadd.xlane.f32.xlu0 %v535_v40  ;;  %v1313_v49 = vmax.f32 %v486_v37, 0.0 }
 0x12a   :  { %v536_v43 = vmul.f32 %v1309_v44, %v1309_v44  ;;  %v552_v52 = vmul.f32 %v1313_v49, %v1313_v49 }
 0x12c   :  { %583 = vadd.xlane.f32.xlu1 %v536_v43  ;;  %613 = vadd.xlane.f32.xlu0 %v551_v48 }
 0x130   :  { %615 = vadd.xlane.f32.xlu1 %v552_v52 }
 0x179   :  { %v554_v54 = vpop.xlane.xlu0 %553 }
 0x17a   :  { %v617_v55 = vmax.f32 %v554_v54, 1e-24 }
 0x17c   :  { %902 = vrsqrt.f32 %v617_v55 }
 0x17d   :  { %v588_v56 = vpop.xlane.xlu1 %587  ;;  %v586_v57 = vpop.xlane.xlu0 %585 }
 0x17e   :  { %v634_v60 = vmax.f32 %v588_v56, 1e-24  ;;  %v633_v1 = vmax.f32 %v586_v57, 1e-24 }
 0x180   :  { %904 = vrsqrt.f32 %v634_v60 }
 0x181   :  { %906 = vrsqrt.f32 %v633_v1  ;;  %v558_v2 = vpop.xlane.xlu1 %557  ;;  %v556_v3 = vpop.xlane.xlu0 %555 }
 0x182   :  { %v619_v4 = vmax.f32 %v558_v2, 1e-24  ;;  %v618_v7 = vmax.f32 %v556_v3, 1e-24 }
 0x184   :  { %908 = vrsqrt.f32 %v619_v4 }
 0x185   :  { %910 = vrsqrt.f32 %v618_v7  ;;  %v560_v10 = vpop.xlane.xlu1 %559  ;;  %v590_v11 = vpop.xlane.xlu0 %589 }
 0x186   :  { %v620_v12 = vmax.f32 %v560_v10, 1e-24  ;;  %v635_v14 = vmax.f32 %v590_v11, 1e-24 }
 0x188   :  { %912 = vrsqrt.f32 %v620_v12 }
 0x189   :  { %v903_v16 = vpop.eup %902  ;;  %914 = vrsqrt.f32 %v635_v14  ;;  %v592_v17 = vpop.xlane.xlu1 %591 }
 0x18a   :  { %v562_v21 = vpop.xlane.xlu0 %561  ;;  %v681_v22 = vmul.f32 %v903_v16, %v1161_v50  ;;  %v636_v23 = vmax.f32 %v592_v17, 1e-24 }
 0x18b   :  { %v621_v27 = vmax.f32 %v562_v21, 1e-24 }
 0x18c   :  { %713 = vst [vmem:[#allocation2] sm:$0xff] %v681_v22  ;;  %916 = vrsqrt.f32 %v636_v23 }
 0x18d   :  { %v905_v28 = vpop.eup %904  ;;  %918 = vrsqrt.f32 %v621_v27  ;;  %v564_v31 = vpop.xlane.xlu1 %563 }
 0x18e   :  { %v594_v34 = vpop.xlane.xlu0 %593  ;;  %v907_v36 = vpop.eup %906  ;;  %v698_v37 = vmul.f32 %v905_v28, %v1169_v59  ;;  %v622_v38 = vmax.f32 %v564_v31, 1e-24 }
 0x18f   :  { %v637_v40 = vmax.f32 %v594_v34, 1e-24  ;;  %v697_v41 = vmul.f32 %v907_v36, %v1163_v51 }
 0x190   :  { %730 = vst [vmem:[#allocation2 + $0x88] sm:$0xff] %v698_v37  ;;  %920 = vrsqrt.f32 %v622_v38 }
 0x191   :  { %v909_v42 = vpop.eup %908  ;;  %729 = vst [vmem:[#allocation2 + $0x80] sm:$0xff] %v697_v41  ;;  %922 = vrsqrt.f32 %v637_v40  ;;  %v596_v50 = vpop.xlane.xlu1 %595 }
 0x192   :  { %v566_v48 = vpop.xlane.xlu0 %565  ;;  %v911_v43 = vpop.eup %910  ;;  %v683_v52 = vmul.f32 %v909_v42, %v1179_v5  ;;  %v638_v54 = vmax.f32 %v596_v50, 1e-24 }
 0x193   :  { %v623_v55 = vmax.f32 %v566_v48, 1e-24  ;;  %v682_v56 = vmul.f32 %v911_v43, %v1173_v63 }
 0x194   :  { %715 = vst [vmem:[#allocation2 + $0x10] sm:$0xff] %v683_v52  ;;  %924 = vrsqrt.f32 %v638_v54 }
 0x195   :  { %v913_v59 = vpop.eup %912  ;;  %714 = vst [vmem:[#allocation2 + $0x8] sm:$0xff] %v682_v56  ;;  %926 = vrsqrt.f32 %v623_v55  ;;  %v568_v51 = vpop.xlane.xlu1 %567 }
 0x196   :  { %v598_v57 = vpop.xlane.xlu0 %597  ;;  %v915_v60 = vpop.eup %914  ;;  %v684_v1 = vmul.f32 %v913_v59, %v1189_v15  ;;  %v624_v2 = vmax.f32 %v568_v51, 1e-24 }
 0x197   :  { %v639_v3 = vmax.f32 %v598_v57, 1e-24  ;;  %v699_v4 = vmul.f32 %v915_v60, %v1181_v6 }
 0x198   :  { %716 = vst [vmem:[#allocation2 + $0x18] sm:$0xff] %v684_v1  ;;  %928 = vrsqrt.f32 %v624_v2 }
 0x199   :  { %v917_v5 = vpop.eup %916  ;;  %731 = vst [vmem:[#allocation2 + $0x90] sm:$0xff] %v699_v4  ;;  %930 = vrsqrt.f32 %v639_v3  ;;  %v600_v63 = vpop.xlane.xlu1 %599 }
 0x19a   :  { %v570_v7 = vpop.xlane.xlu0 %569  ;;  %v919_v10 = vpop.eup %918  ;;  %v700_v11 = vmul.f32 %v917_v5, %v1193_v19  ;;  %v640_v12 = vmax.f32 %v600_v63, 1e-24 }
 0x19b   :  { %v625_v14 = vmax.f32 %v570_v7, 1e-24  ;;  %v685_v16 = vmul.f32 %v919_v10, %v1199_v25 }
 0x19c   :  { %732 = vst [vmem:[#allocation2 + $0x98] sm:$0xff] %v700_v11  ;;  %932 = vrsqrt.f32 %v640_v12 }
 0x19d   :  { %v921_v15 = vpop.eup %920  ;;  %717 = vst [vmem:[#allocation2 + $0x20] sm:$0xff] %v685_v16  ;;  %934 = vrsqrt.f32 %v625_v14  ;;  %v572_v6 = vpop.xlane.xlu1 %571 }
 0x19e   :  { %v602_v17 = vpop.xlane.xlu0 %601  ;;  %v923_v21 = vpop.eup %922  ;;  %v686_v22 = vmul.f32 %v921_v15, %v1209_v35  ;;  %v626_v23 = vmax.f32 %v572_v6, 1e-24 }
 0x19f   :  { %v641_v27 = vmax.f32 %v602_v17, 1e-24  ;;  %v701_v28 = vmul.f32 %v923_v21, %v1201_v26 }
 0x1a0   :  { %718 = vst [vmem:[#allocation2 + $0x28] sm:$0xff] %v686_v22  ;;  %936 = vrsqrt.f32 %v626_v23 }
 0x1a1   :  { %v925_v19 = vpop.eup %924  ;;  %733 = vst [vmem:[#allocation2 + $0xa0] sm:$0xff] %v701_v28  ;;  %938 = vrsqrt.f32 %v641_v27  ;;  %v604_v25 = vpop.xlane.xlu1 %603 }
 0x1a2   :  { %v574_v31 = vpop.xlane.xlu0 %573  ;;  %v927_v34 = vpop.eup %926  ;;  %v702_v36 = vmul.f32 %v925_v19, %v1213_v39  ;;  %v642_v37 = vmax.f32 %v604_v25, 1e-24 }
 0x1a3   :  { %v627_v38 = vmax.f32 %v574_v31, 1e-24  ;;  %v687_v40 = vmul.f32 %v927_v34, %v1219_v46 }
 0x1a4   :  { %734 = vst [vmem:[#allocation2 + $0xa8] sm:$0xff] %v702_v36  ;;  %940 = vrsqrt.f32 %v642_v37 }
 0x1a5   :  { %v929_v35 = vpop.eup %928  ;;  %719 = vst [vmem:[#allocation2 + $0x30] sm:$0xff] %v687_v40  ;;  %942 = vrsqrt.f32 %v627_v38  ;;  %v576_v26 = vpop.xlane.xlu1 %575 }
 0x1a6   :  { %v606_v41 = vpop.xlane.xlu0 %605  ;;  %v931_v42 = vpop.eup %930  ;;  %v688_v50 = vmul.f32 %v929_v35, %v1229_v58  ;;  %v628_v48 = vmax.f32 %v576_v26, 1e-24 }
 0x1a7   :  { %v643_v43 = vmax.f32 %v606_v41, 1e-24  ;;  %v703_v52 = vmul.f32 %v931_v42, %v1221_v47 }
 0x1a8   :  { %720 = vst [vmem:[#allocation2 + $0x38] sm:$0xff] %v688_v50  ;;  %944 = vrsqrt.f32 %v628_v48 }
 0x1a9   :  { %v933_v39 = vpop.eup %932  ;;  %735 = vst [vmem:[#allocation2 + $0xb0] sm:$0xff] %v703_v52  ;;  %946 = vrsqrt.f32 %v643_v43  ;;  %v608_v46 = vpop.xlane.xlu1 %607 }
 0x1aa   :  { %v578_v54 = vpop.xlane.xlu0 %577  ;;  %v935_v55 = vpop.eup %934  ;;  %v704_v56 = vmul.f32 %v933_v39, %v1233_v0  ;;  %v644_v59 = vmax.f32 %v608_v46, 1e-24 }
 0x1ab   :  { %v629_v51 = vmax.f32 %v578_v54, 1e-24  ;;  %v689_v57 = vmul.f32 %v935_v55, %v1239_v8 }
 0x1ac   :  { %736 = vst [vmem:[#allocation2 + $0xb8] sm:$0xff] %v704_v56  ;;  %948 = vrsqrt.f32 %v644_v59 }
 0x1ad   :  { %v937_v58 = vpop.eup %936  ;;  %721 = vst [vmem:[#allocation2 + $0x40] sm:$0xff] %v689_v57  ;;  %950 = vrsqrt.f32 %v629_v51  ;;  %v580_v47 = vpop.xlane.xlu1 %579 }
 0x1ae   :  { %v610_v60 = vpop.xlane.xlu0 %609  ;;  %v939_v1 = vpop.eup %938  ;;  %v690_v2 = vmul.f32 %v937_v58, %v1249_v20  ;;  %v630_v3 = vmax.f32 %v580_v47, 1e-24 }
 0x1af   :  { %v645_v4 = vmax.f32 %v610_v60, 1e-24  ;;  %v705_v5 = vmul.f32 %v939_v1, %v1241_v9 }
 0x1b0   :  { %722 = vst [vmem:[#allocation2 + $0x48] sm:$0xff] %v690_v2  ;;  %952 = vrsqrt.f32 %v630_v3 }
 0x1b1   :  { %v941_v0 = vpop.eup %940  ;;  %737 = vst [vmem:[#allocation2 + $0xc0] sm:$0xff] %v705_v5  ;;  %954 = vrsqrt.f32 %v645_v4  ;;  %v612_v8 = vpop.xlane.xlu1 %611 }
 0x1b2   :  { %v582_v63 = vpop.xlane.xlu0 %581  ;;  %v943_v7 = vpop.eup %942  ;;  %v706_v10 = vmul.f32 %v941_v0, %v1253_v24  ;;  %v646_v11 = vmax.f32 %v612_v8, 1e-24 }
 0x1b3   :  { %v631_v12 = vmax.f32 %v582_v63, 1e-24  ;;  %v691_v14 = vmul.f32 %v943_v7, %v1259_v32 }
 0x1b4   :  { %738 = vst [vmem:[#allocation2 + $0xc8] sm:$0xff] %v706_v10  ;;  %956 = vrsqrt.f32 %v646_v11 }
 0x1b5   :  { %v945_v20 = vpop.eup %944  ;;  %723 = vst [vmem:[#allocation2 + $0x50] sm:$0xff] %v691_v14  ;;  %958 = vrsqrt.f32 %v631_v12  ;;  %v584_v9 = vpop.xlane.xlu1 %583 }
 0x1b6   :  { %v614_v16 = vpop.xlane.xlu0 %613  ;;  %v947_v15 = vpop.eup %946  ;;  %v692_v6 = vmul.f32 %v945_v20, %v1269_v45  ;;  %v632_v17 = vmax.f32 %v584_v9, 1e-24 }
 0x1b7   :  { %v647_v21 = vmax.f32 %v614_v16, 1e-24  ;;  %v707_v22 = vmul.f32 %v947_v15, %v1261_v33 }
 0x1b8   :  { %724 = vst [vmem:[#allocation2 + $0x58] sm:$0xff] %v692_v6  ;;  %960 = vrsqrt.f32 %v632_v17 }
 0x1b9   :  { %v949_v24 = vpop.eup %948  ;;  %739 = vst [vmem:[#allocation2 + $0xd0] sm:$0xff] %v707_v22  ;;  %962 = vrsqrt.f32 %v647_v21  ;;  %v616_v32 = vpop.xlane.xlu1 %615 }
 0x1ba   :  { %v951_v23 = vpop.eup %950  ;;  %v708_v27 = vmul.f32 %v949_v24, %v1273_v53  ;;  %v648_v28 = vmax.f32 %v616_v32, 1e-24 }
 0x1bb   :  { %v693_v19 = vmul.f32 %v951_v23, %v1279_v61 }
 0x1bc   :  { %740 = vst [vmem:[#allocation2 + $0xd8] sm:$0xff] %v708_v27  ;;  %964 = vrsqrt.f32 %v648_v28 }
 0x1bd   :  { %v953_v25 = vpop.eup %952  ;;  %725 = vst [vmem:[#allocation2 + $0x60] sm:$0xff] %v693_v19 }
 0x1be   :  { %v955_v45 = vpop.eup %954  ;;  %v694_v31 = vmul.f32 %v953_v25, %v1289_v13 }
 0x1bf   :  { %v709_v33 = vmul.f32 %v955_v45, %v1281_v62 }
 0x1c0   :  { %726 = vst [vmem:[#allocation2 + $0x68] sm:$0xff] %v694_v31 }
 0x1c1   :  { %v957_v34 = vpop.eup %956  ;;  %741 = vst [vmem:[#allocation2 + $0xe0] sm:$0xff] %v709_v33 }
 0x1c2   :  { %v959_v36 = vpop.eup %958  ;;  %v710_v37 = vmul.f32 %v957_v34, %v1293_v18 }
 0x1c3   :  { %v695_v53 = vmul.f32 %v959_v36, %v1299_v29 }
 0x1c4   :  { %742 = vst [vmem:[#allocation2 + $0xe8] sm:$0xff] %v710_v37 }
 0x1c5   :  { %v961_v38 = vpop.eup %960  ;;  %727 = vst [vmem:[#allocation2 + $0x70] sm:$0xff] %v695_v53 }
 0x1c6   :  { %v963_v61 = vpop.eup %962  ;;  %v696_v40 = vmul.f32 %v961_v38, %v1309_v44 }
 0x1c7   :  { %v711_v35 = vmul.f32 %v963_v61, %v1301_v30 }
 0x1c8   :  { %728 = vst [vmem:[#allocation2 + $0x78] sm:$0xff] %v696_v40 }
 0x1c9   :  { %v965_v62 = vpop.eup %964  ;;  %743 = vst [vmem:[#allocation2 + $0xf0] sm:$0xff] %v711_v35 }
 0x1ca   :  { %v712_v13 = vmul.f32 %v965_v62, %v1313_v49 }
 0x1cc   :  { %744 = vst [vmem:[#allocation2 + $0xf8] sm:$0xff] %v712_v13 }
 0x1cd   :  { %977 = shalt.err (!%p974_p4)
}
 0x1ce   :  { %s990_s16 = smov 128   ;;  %s991_s1 = smov 8  }
 0x1cf   :  { %756 = dma.vmem_to_hbm [thread:$0]  %s751_s2, 4096, %s1357_s3, [#allocation3], %s990_s16, %s990_s16, %s991_s1  }
 0x1d0   :  { %986 = dma.done.wait [#allocation3], 4096  }
 0x1d1   :  { %987 = vsyncadd [#allocation3], 4294963200 }
 0x1d2   :  { %760 = vsyncpa [#allocation3], 1 }

</bundles_post_ra>
